<compile_context>
chip_gen: v5e
topology: v5e:2x2
jax: 0.10.0
libtpu: 0.0.40
codegen_flags: <defaults>
</compile_context>

<pallas_src>
import functools

import jax
import jax.numpy as jnp
from jax import lax
from jax.experimental import pallas as pl
from jax.experimental.pallas import tpu as pltpu

IDIM = 32
NHID = [64, 32]
ODIM = 1
NORM_EMB = True
OUTPUT_ACT = False
EPS = 1e-12                # torch.nn.functional.normalize default eps
N_CHUNKS = 6               # input_form == 'comet' -> 6 * IDIM features
DEFAULT_TB = 1024          # batch rows per grid step (production tile)


def _round_up(x, m):
    return (x + m - 1) // m * m


def _l2norm_fast(x):
    # F.normalize: x / max(||x||_2, eps).  x * rsqrt(max(ss, eps^2)) keeps the
    # work on the EUP slot; differs from torch only when ||x|| < 1e-12.
    ss = jnp.sum(x * x, axis=-1, keepdims=True)
    return x * lax.rsqrt(jnp.maximum(ss, EPS * EPS))


def blaser_kernel(x_ref, w0_ref, b0_ref, w1_ref, b1_ref, w2_ref, b2_ref, out_ref):
    # x_ref: [3, TB, IDIM] bf16 (src, ref, mt stacked on the leading axis).
    # Leading-axis indexing is free (no lane relayout).  Elementwise math in f32.
    src = x_ref[0].astype(jnp.float32)
    ref = x_ref[1].astype(jnp.float32)
    mt = x_ref[2].astype(jnp.float32)

    if NORM_EMB:
        src = _l2norm_fast(src)
        ref = _l2norm_fast(ref)
        mt = _l2norm_fast(mt)

    # 'comet' features kept as six separate IDIM-wide chunks (no lane-crossing
    # concat); first Linear computed as b0 + sum_k feat_k @ W0[k].
    feats = (ref, mt, src * mt, ref * mt, jnp.abs(mt - src), jnp.abs(mt - ref))
    h = b0_ref[...]                                          # [1, NHID0] f32
    for k, f in enumerate(feats):
        h = h + jnp.dot(f.astype(jnp.bfloat16), w0_ref[k],
                        preferred_element_type=jnp.float32)
    h = jnp.tanh(h)

    h = jnp.tanh(jnp.dot(h.astype(jnp.bfloat16), w1_ref[...],
                         preferred_element_type=jnp.float32) + b1_ref[...])

    y = jnp.dot(h.astype(jnp.bfloat16), w2_ref[...],
                preferred_element_type=jnp.float32) + b2_ref[...]
    if OUTPUT_ACT:
        y = jnp.tanh(y)
    out_ref[...] = y.astype(out_ref.dtype)


@functools.partial(jax.jit, static_argnames=("tb",))
def blaser_forward(src, ref, mt, params, tb=DEFAULT_TB):
    """params: list of (W[in, out], b[1, out]) f32 for the three Linear layers."""
    B = src.shape[0]
    TB = min(tb, _round_up(B, 16))
    B_pad = _round_up(B, TB)

    # Pack + pad + bf16-cast (fuses into one pass under jit; in a real pipeline
    # the embedding producer would emit this layout directly).
    x = jnp.stack([src, ref, mt], axis=0)                    # [3, B, IDIM]
    if B_pad != B:
        x = jnp.pad(x, ((0, 0), (0, B_pad - B), (0, 0)))     # zero rows -> norm 0, harmless
    x = x.astype(jnp.bfloat16)

    (w0, b0), (w1, b1), (w2, b2) = params
    w0s = jnp.stack(jnp.split(w0, N_CHUNKS, axis=0), axis=0).astype(jnp.bfloat16)
    w1b = w1.astype(jnp.bfloat16)
    w2b = w2.astype(jnp.bfloat16)

    grid = (B_pad // TB,)
    const2 = lambda i: (0, 0)
    const3 = lambda i: (0, 0, 0)

    out = pl.pallas_call(
        blaser_kernel,
        out_shape=jax.ShapeDtypeStruct((B_pad, ODIM), jnp.float32),
        grid_spec=pltpu.PrefetchScalarGridSpec(
            num_scalar_prefetch=0,
            grid=grid,
            in_specs=[
                pl.BlockSpec((3, TB, IDIM), lambda i: (0, i, 0)),    # batch-tiled input
                pl.BlockSpec((N_CHUNKS, IDIM, NHID[0]), const3),     # resident weights
                pl.BlockSpec((1, NHID[0]), const2),
                pl.BlockSpec((NHID[0], NHID[1]), const2),
                pl.BlockSpec((1, NHID[1]), const2),
                pl.BlockSpec((NHID[1], ODIM), const2),
                pl.BlockSpec((1, ODIM), const2),
            ],
            out_specs=pl.BlockSpec((TB, ODIM), lambda i: (i, 0)),
        ),
        compiler_params=pltpu.CompilerParams(
            dimension_semantics=("parallel",),                       # v7x megacore
        ),
    )(x, w0s, b0, w1b, b1, w2b, b2)
    return out[:B]


def blaser_reference(src, ref, mt, params, bf16=True):
    """Plain-JAX reference.  bf16=True mirrors the kernel's quantization
    (bf16 storage + bf16 MXU operands, f32 accumulation); bf16=False is the
    exact f32 (torch-faithful) forward."""
    dt = jnp.bfloat16 if bf16 else jnp.float32
    q = lambda a: a.astype(dt).astype(jnp.float32)

    def l2(v):
        n = jnp.sqrt(jnp.sum(v * v, axis=-1, keepdims=True))
        return v / jnp.maximum(n, EPS)

    src, ref, mt = q(src), q(ref), q(mt)
    if NORM_EMB:
        src, ref, mt = l2(src), l2(ref), l2(mt)
    x = jnp.concatenate(
        [ref, mt, src * mt, ref * mt, jnp.abs(mt - src), jnp.abs(mt - ref)],
        axis=-1,
    )
    n_layers = len(params)
    for i, (w, b) in enumerate(params):
        x = jnp.dot(x.astype(dt), w.astype(dt),
                    preferred_element_type=jnp.float32) + b
        if i < n_layers - 1 or OUTPUT_ACT:
            x = jnp.tanh(x)
    return x


def init_params(key):
    """Deterministic init matching nn.Linear's U(-1/sqrt(fan_in), 1/sqrt(fan_in))."""
    dims = [N_CHUNKS * IDIM] + [nh for nh in NHID if nh > 0] + [ODIM]
    params = []
    for din, dout in zip(dims[:-1], dims[1:]):
        key, kw, kb = jax.random.split(key, 3)
        bound = 1.0 / (din ** 0.5)
        w = jax.random.uniform(kw, (din, dout), jnp.float32, -bound, bound)
        b = jax.random.uniform(kb, (1, dout), jnp.float32, -bound, bound)
        params.append((w, b))
    return params


if __name__ == "__main__":
    key = jax.random.PRNGKey(0)
    k_src, k_ref, k_mt, k_par = jax.random.split(key, 4)

    B = 8
    src = jax.random.normal(k_src, (B, IDIM), jnp.float32)
    ref = jax.random.normal(k_ref, (B, IDIM), jnp.float32)
    mt = jax.random.normal(k_mt, (B, IDIM), jnp.float32)
    params = init_params(k_par)

    out = blaser_forward(src, ref, mt, params)
    out = jax.block_until_ready(out)
    assert out.shape == (B, ODIM), out.shape

    # Tight check vs. a reference mirroring the kernel's bf16 quantization.
    exp_q = blaser_reference(src, ref, mt, params, bf16=True)
    assert jnp.allclose(out, exp_q, atol=5e-3, rtol=5e-3), (
        f"bf16-mirror max abs diff {jnp.max(jnp.abs(out - exp_q))}"
    )
    # Loose check vs. the exact f32 (torch-faithful) forward; bf16 inputs
    # require the relaxed tolerance.
    exp_f32 = blaser_reference(src, ref, mt, params, bf16=False)
    assert jnp.allclose(out, exp_f32, atol=3e-2, rtol=3e-2), (
        f"f32-exact max abs diff {jnp.max(jnp.abs(out - exp_f32))}"
    )
    print("KERNEL_OK")
</pallas_src>

<mosaic_0001>
module attributes {stable_mosaic.version = 11 : i64} {
  func.func @blaser_kernel(%arg0: i32, %arg1: memref<3x16x32xbf16, #tpu.memory_space<vmem>>, %arg2: memref<6x32x64xbf16, #tpu.memory_space<vmem>>, %arg3: memref<1x64xf32, #tpu.memory_space<vmem>>, %arg4: memref<64x32xbf16, #tpu.memory_space<vmem>>, %arg5: memref<1x32xf32, #tpu.memory_space<vmem>>, %arg6: memref<32x1xbf16, #tpu.memory_space<vmem>>, %arg7: memref<1x1xf32, #tpu.memory_space<vmem>>, %arg8: memref<16x1xf32, #tpu.memory_space<vmem>>) attributes {dimension_semantics = [#tpu.dimension_semantics<parallel>], iteration_bounds = array<i64: 1>, scalar_prefetch = 0 : i64, scratch_operands = 0 : i64, tpu.core_type = #tpu.core_type<tc>, window_params = [{transform_indices = @transform_0, window_bounds = array<i64: 3, 16, 32>}, {pipeline_mode = #tpu.pipeline_mode<synchronous>, transform_indices = @transform_1, window_bounds = array<i64: 6, 32, 64>}, {pipeline_mode = #tpu.pipeline_mode<synchronous>, transform_indices = @transform_2, window_bounds = array<i64: 1, 64>}, {pipeline_mode = #tpu.pipeline_mode<synchronous>, transform_indices = @transform_3, window_bounds = array<i64: 64, 32>}, {pipeline_mode = #tpu.pipeline_mode<synchronous>, transform_indices = @transform_4, window_bounds = array<i64: 1, 32>}, {pipeline_mode = #tpu.pipeline_mode<synchronous>, transform_indices = @transform_5, window_bounds = array<i64: 32, 1>}, {pipeline_mode = #tpu.pipeline_mode<synchronous>, transform_indices = @transform_6, window_bounds = array<i64: 1, 1>}, {transform_indices = @transform_7, window_bounds = array<i64: 16, 1>}]} {
    %c0 = arith.constant 0 : index
    %c0_0 = arith.constant 0 : index
    %c0_1 = arith.constant 0 : index
    %0 = vector.load %arg1[%c0, %c0_0, %c0_1] : memref<3x16x32xbf16, #tpu.memory_space<vmem>>, vector<1x16x32xbf16>
    %1 = vector.shape_cast %0 : vector<1x16x32xbf16> to vector<16x32xbf16>
    %2 = arith.extf %1 : vector<16x32xbf16> to vector<16x32xf32>
    %c1 = arith.constant 1 : index
    %c0_2 = arith.constant 0 : index
    %c0_3 = arith.constant 0 : index
    %3 = vector.load %arg1[%c1, %c0_2, %c0_3] : memref<3x16x32xbf16, #tpu.memory_space<vmem>>, vector<1x16x32xbf16>
    %4 = vector.shape_cast %3 : vector<1x16x32xbf16> to vector<16x32xbf16>
    %5 = arith.extf %4 : vector<16x32xbf16> to vector<16x32xf32>
    %c2 = arith.constant 2 : index
    %c0_4 = arith.constant 0 : index
    %c0_5 = arith.constant 0 : index
    %6 = vector.load %arg1[%c2, %c0_4, %c0_5] : memref<3x16x32xbf16, #tpu.memory_space<vmem>>, vector<1x16x32xbf16>
    %7 = vector.shape_cast %6 : vector<1x16x32xbf16> to vector<16x32xbf16>
    %8 = arith.extf %7 : vector<16x32xbf16> to vector<16x32xf32>
    %9 = arith.mulf %2, %2 : vector<16x32xf32>
    %cst = arith.constant dense<0.000000e+00> : vector<16xf32>
    %10 = vector.multi_reduction <add>, %9, %cst [1] : vector<16x32xf32> to vector<16xf32>
    %11 = vector.shape_cast %10 : vector<16xf32> to vector<16x1xf32>
    %cst_6 = arith.constant 1.000000e-24 : f32
    %12 = vector.broadcast %cst_6 : f32 to vector<16x1xf32>
    %13 = arith.maximumf %11, %12 : vector<16x1xf32>
    %14 = math.rsqrt %13 : vector<16x1xf32>
    %15 = vector.broadcast %14 : vector<16x1xf32> to vector<16x32xf32>
    %16 = arith.mulf %2, %15 : vector<16x32xf32>
    %17 = arith.mulf %5, %5 : vector<16x32xf32>
    %cst_7 = arith.constant dense<0.000000e+00> : vector<16xf32>
    %18 = vector.multi_reduction <add>, %17, %cst_7 [1] : vector<16x32xf32> to vector<16xf32>
    %19 = vector.shape_cast %18 : vector<16xf32> to vector<16x1xf32>
    %cst_8 = arith.constant 1.000000e-24 : f32
    %20 = vector.broadcast %cst_8 : f32 to vector<16x1xf32>
    %21 = arith.maximumf %19, %20 : vector<16x1xf32>
    %22 = math.rsqrt %21 : vector<16x1xf32>
    %23 = vector.broadcast %22 : vector<16x1xf32> to vector<16x32xf32>
    %24 = arith.mulf %5, %23 : vector<16x32xf32>
    %25 = arith.mulf %8, %8 : vector<16x32xf32>
    %cst_9 = arith.constant dense<0.000000e+00> : vector<16xf32>
    %26 = vector.multi_reduction <add>, %25, %cst_9 [1] : vector<16x32xf32> to vector<16xf32>
    %27 = vector.shape_cast %26 : vector<16xf32> to vector<16x1xf32>
    %cst_10 = arith.constant 1.000000e-24 : f32
    %28 = vector.broadcast %cst_10 : f32 to vector<16x1xf32>
    %29 = arith.maximumf %27, %28 : vector<16x1xf32>
    %30 = math.rsqrt %29 : vector<16x1xf32>
    %31 = vector.broadcast %30 : vector<16x1xf32> to vector<16x32xf32>
    %32 = arith.mulf %8, %31 : vector<16x32xf32>
    %33 = arith.mulf %16, %32 : vector<16x32xf32>
    %34 = arith.mulf %24, %32 : vector<16x32xf32>
    %35 = arith.subf %32, %16 : vector<16x32xf32>
    %36 = math.absf %35 : vector<16x32xf32>
    %37 = arith.subf %32, %24 : vector<16x32xf32>
    %38 = math.absf %37 : vector<16x32xf32>
    %c0_11 = arith.constant 0 : index
    %c0_12 = arith.constant 0 : index
    %39 = vector.load %arg3[%c0_11, %c0_12] : memref<1x64xf32, #tpu.memory_space<vmem>>, vector<1x64xf32>
    %40 = arith.truncf %24 : vector<16x32xf32> to vector<16x32xbf16>
    %c0_13 = arith.constant 0 : index
    %c0_14 = arith.constant 0 : index
    %c0_15 = arith.constant 0 : index
    %41 = vector.load %arg2[%c0_13, %c0_14, %c0_15] : memref<6x32x64xbf16, #tpu.memory_space<vmem>>, vector<1x32x64xbf16>
    %42 = vector.shape_cast %41 : vector<1x32x64xbf16> to vector<32x64xbf16>
    %cst_16 = arith.constant dense<0.000000e+00> : vector<16x64xf32>
    %43 = tpu.matmul %40, %42, %cst_16 {dimension_numbers = #tpu.dot_dimension_numbers<[1], [0], [0], [1], [0, 0, 1, 1], [], []>} : vector<16x32xbf16>, vector<32x64xbf16>, vector<16x64xf32> -> vector<16x64xf32>
    %44 = vector.broadcast %39 : vector<1x64xf32> to vector<16x64xf32>
    %45 = arith.addf %44, %43 : vector<16x64xf32>
    %46 = arith.truncf %32 : vector<16x32xf32> to vector<16x32xbf16>
    %c1_17 = arith.constant 1 : index
    %c0_18 = arith.constant 0 : index
    %c0_19 = arith.constant 0 : index
    %47 = vector.load %arg2[%c1_17, %c0_18, %c0_19] : memref<6x32x64xbf16, #tpu.memory_space<vmem>>, vector<1x32x64xbf16>
    %48 = vector.shape_cast %47 : vector<1x32x64xbf16> to vector<32x64xbf16>
    %cst_20 = arith.constant dense<0.000000e+00> : vector<16x64xf32>
    %49 = tpu.matmul %46, %48, %cst_20 {dimension_numbers = #tpu.dot_dimension_numbers<[1], [0], [0], [1], [0, 0, 1, 1], [], []>} : vector<16x32xbf16>, vector<32x64xbf16>, vector<16x64xf32> -> vector<16x64xf32>
    %50 = arith.addf %45, %49 : vector<16x64xf32>
    %51 = arith.truncf %33 : vector<16x32xf32> to vector<16x32xbf16>
    %c2_21 = arith.constant 2 : index
    %c0_22 = arith.constant 0 : index
    %c0_23 = arith.constant 0 : index
    %52 = vector.load %arg2[%c2_21, %c0_22, %c0_23] : memref<6x32x64xbf16, #tpu.memory_space<vmem>>, vector<1x32x64xbf16>
    %53 = vector.shape_cast %52 : vector<1x32x64xbf16> to vector<32x64xbf16>
    %cst_24 = arith.constant dense<0.000000e+00> : vector<16x64xf32>
    %54 = tpu.matmul %51, %53, %cst_24 {dimension_numbers = #tpu.dot_dimension_numbers<[1], [0], [0], [1], [0, 0, 1, 1], [], []>} : vector<16x32xbf16>, vector<32x64xbf16>, vector<16x64xf32> -> vector<16x64xf32>
    %55 = arith.addf %50, %54 : vector<16x64xf32>
    %56 = arith.truncf %34 : vector<16x32xf32> to vector<16x32xbf16>
    %c3 = arith.constant 3 : index
    %c0_25 = arith.constant 0 : index
    %c0_26 = arith.constant 0 : index
    %57 = vector.load %arg2[%c3, %c0_25, %c0_26] : memref<6x32x64xbf16, #tpu.memory_space<vmem>>, vector<1x32x64xbf16>
    %58 = vector.shape_cast %57 : vector<1x32x64xbf16> to vector<32x64xbf16>
    %cst_27 = arith.constant dense<0.000000e+00> : vector<16x64xf32>
    %59 = tpu.matmul %56, %58, %cst_27 {dimension_numbers = #tpu.dot_dimension_numbers<[1], [0], [0], [1], [0, 0, 1, 1], [], []>} : vector<16x32xbf16>, vector<32x64xbf16>, vector<16x64xf32> -> vector<16x64xf32>
    %60 = arith.addf %55, %59 : vector<16x64xf32>
    %61 = arith.truncf %36 : vector<16x32xf32> to vector<16x32xbf16>
    %c4 = arith.constant 4 : index
    %c0_28 = arith.constant 0 : index
    %c0_29 = arith.constant 0 : index
    %62 = vector.load %arg2[%c4, %c0_28, %c0_29] : memref<6x32x64xbf16, #tpu.memory_space<vmem>>, vector<1x32x64xbf16>
    %63 = vector.shape_cast %62 : vector<1x32x64xbf16> to vector<32x64xbf16>
    %cst_30 = arith.constant dense<0.000000e+00> : vector<16x64xf32>
    %64 = tpu.matmul %61, %63, %cst_30 {dimension_numbers = #tpu.dot_dimension_numbers<[1], [0], [0], [1], [0, 0, 1, 1], [], []>} : vector<16x32xbf16>, vector<32x64xbf16>, vector<16x64xf32> -> vector<16x64xf32>
    %65 = arith.addf %60, %64 : vector<16x64xf32>
    %66 = arith.truncf %38 : vector<16x32xf32> to vector<16x32xbf16>
    %c5 = arith.constant 5 : index
    %c0_31 = arith.constant 0 : index
    %c0_32 = arith.constant 0 : index
    %67 = vector.load %arg2[%c5, %c0_31, %c0_32] : memref<6x32x64xbf16, #tpu.memory_space<vmem>>, vector<1x32x64xbf16>
    %68 = vector.shape_cast %67 : vector<1x32x64xbf16> to vector<32x64xbf16>
    %cst_33 = arith.constant dense<0.000000e+00> : vector<16x64xf32>
    %69 = tpu.matmul %66, %68, %cst_33 {dimension_numbers = #tpu.dot_dimension_numbers<[1], [0], [0], [1], [0, 0, 1, 1], [], []>} : vector<16x32xbf16>, vector<32x64xbf16>, vector<16x64xf32> -> vector<16x64xf32>
    %70 = arith.addf %65, %69 : vector<16x64xf32>
    %71 = math.tanh %70 : vector<16x64xf32>
    %72 = arith.truncf %71 : vector<16x64xf32> to vector<16x64xbf16>
    %c0_34 = arith.constant 0 : index
    %c0_35 = arith.constant 0 : index
    %73 = vector.load %arg4[%c0_34, %c0_35] : memref<64x32xbf16, #tpu.memory_space<vmem>>, vector<64x32xbf16>
    %cst_36 = arith.constant dense<0.000000e+00> : vector<16x32xf32>
    %74 = tpu.matmul %72, %73, %cst_36 {dimension_numbers = #tpu.dot_dimension_numbers<[1], [0], [0], [1], [0, 0, 1, 1], [], []>} : vector<16x64xbf16>, vector<64x32xbf16>, vector<16x32xf32> -> vector<16x32xf32>
    %c0_37 = arith.constant 0 : index
    %c0_38 = arith.constant 0 : index
    %75 = vector.load %arg5[%c0_37, %c0_38] : memref<1x32xf32, #tpu.memory_space<vmem>>, vector<1x32xf32>
    %76 = vector.broadcast %75 : vector<1x32xf32> to vector<16x32xf32>
    %77 = arith.addf %74, %76 : vector<16x32xf32>
    %78 = math.tanh %77 : vector<16x32xf32>
    %79 = arith.truncf %78 : vector<16x32xf32> to vector<16x32xbf16>
    %c0_39 = arith.constant 0 : index
    %c0_40 = arith.constant 0 : index
    %80 = vector.load %arg6[%c0_39, %c0_40] : memref<32x1xbf16, #tpu.memory_space<vmem>>, vector<32x1xbf16>
    %cst_41 = arith.constant dense<0.000000e+00> : vector<16x1xf32>
    %81 = tpu.matmul %79, %80, %cst_41 {dimension_numbers = #tpu.dot_dimension_numbers<[1], [0], [0], [1], [0, 0, 1, 1], [], []>} : vector<16x32xbf16>, vector<32x1xbf16>, vector<16x1xf32> -> vector<16x1xf32>
    %c0_42 = arith.constant 0 : index
    %c0_43 = arith.constant 0 : index
    %82 = vector.load %arg7[%c0_42, %c0_43] : memref<1x1xf32, #tpu.memory_space<vmem>>, vector<1x1xf32>
    %83 = vector.broadcast %82 : vector<1x1xf32> to vector<16x1xf32>
    %84 = arith.addf %81, %83 : vector<16x1xf32>
    %c0_44 = arith.constant 0 : index
    %c0_45 = arith.constant 0 : index
    %85 = vector.load %arg8[%c0_44, %c0_45] : memref<16x1xf32, #tpu.memory_space<vmem>>, vector<16x1xf32>
    tpu.vector_store %arg8[%c0_44, %c0_45], %84 {strides = array<i32>} : memref<16x1xf32, #tpu.memory_space<vmem>>, vector<16x1xf32>,
    return
  }
  func.func @transform_0(%arg0: i32) -> (i32, i32, i32) {
    %c0_i32 = arith.constant 0 : i32
    %c0_i32_0 = arith.constant 0 : i32
    %c0_i32_1 = arith.constant 0 : i32
    return %c0_i32, %arg0, %c0_i32_0 : i32, i32, i32
  }
  func.func @transform_1(%arg0: i32) -> (i32, i32, i32) {
    %c0_i32 = arith.constant 0 : i32
    %c0_i32_0 = arith.constant 0 : i32
    %c0_i32_1 = arith.constant 0 : i32
    %c0_i32_2 = arith.constant 0 : i32
    return %c0_i32, %c0_i32_0, %c0_i32_1 : i32, i32, i32
  }
  func.func @transform_2(%arg0: i32) -> (i32, i32) {
    %c0_i32 = arith.constant 0 : i32
    %c0_i32_0 = arith.constant 0 : i32
    %c0_i32_1 = arith.constant 0 : i32
    return %c0_i32, %c0_i32_0 : i32, i32
  }
  func.func @transform_3(%arg0: i32) -> (i32, i32) {
    %c0_i32 = arith.constant 0 : i32
    %c0_i32_0 = arith.constant 0 : i32
    %c0_i32_1 = arith.constant 0 : i32
    return %c0_i32, %c0_i32_0 : i32, i32
  }
  func.func @transform_4(%arg0: i32) -> (i32, i32) {
    %c0_i32 = arith.constant 0 : i32
    %c0_i32_0 = arith.constant 0 : i32
    %c0_i32_1 = arith.constant 0 : i32
    return %c0_i32, %c0_i32_0 : i32, i32
  }
  func.func @transform_5(%arg0: i32) -> (i32, i32) {
    %c0_i32 = arith.constant 0 : i32
    %c0_i32_0 = arith.constant 0 : i32
    %c0_i32_1 = arith.constant 0 : i32
    return %c0_i32, %c0_i32_0 : i32, i32
  }
  func.func @transform_6(%arg0: i32) -> (i32, i32) {
    %c0_i32 = arith.constant 0 : i32
    %c0_i32_0 = arith.constant 0 : i32
    %c0_i32_1 = arith.constant 0 : i32
    return %c0_i32, %c0_i32_0 : i32, i32
  }
  func.func @transform_7(%arg0: i32) -> (i32, i32) {
    %c0_i32 = arith.constant 0 : i32
    %c0_i32_0 = arith.constant 0 : i32
    return %arg0, %c0_i32 : i32, i32
  }
}

</mosaic_0001>

<bundles_post_ra>
// kernel: blaser_forward.1
= control target key start
LH: loop header
LB: loop body
LE: loop exit
PB: predicated region body
PF: predicated region fallthrough
CT: control target
= control target key end

     0   :  { %vm45_vm0 = vcmask 261120   ;;  %s860_s0 = inlined_call_operand.vmem [shape: bf16[3,16,32], index: 0, kind: input, shape index: {}]   ;;  %s861_s2 = inlined_call_operand.vmem [shape: f32[1,64], index: 2, kind: input, shape index: {}]   ;;  %s862_s1 = inlined_call_operand.vmem [shape: bf16[6,32,64], index: 1, kind: input, shape index: {}]   ;;  %s863_s4 = inlined_call_operand.vmem [shape: f32[1,32], index: 4, kind: input, shape index: {}]   ;;  %s864_s3 = inlined_call_operand.vmem [shape: bf16[64,32], index: 3, kind: input, shape index: {}]   ;;  %s865_s5 = inlined_call_operand.vmem [shape: bf16[32,1], index: 5, kind: input, shape index: {}]   ;;  %s866_s6 = inlined_call_operand.<no memory space> [shape: f32[1,1], index: 6, kind: input, shape index: {}]   ;;  %s867_s7 = inlined_call_operand.vmem [shape: f32[16,1], index: 7, kind: output, shape index: {}]  }
   0x1   :  { %v616_v0 = vld [vmem:[%s860_s0 + $0x10] sm:$0xff]   ;;  %v615_v1 = vld [vmem:[%s860_s0 + $0x8] sm:$0xff]   ;;  %v604_v2 = vld [vmem:[%s860_s0] sm:$0xff]  }
   0x2   :  { %v689_v3 = vunpack.c.l.bf16 %v616_v0  ;;  %v691_v4 = vunpack.c.l.bf16 %v615_v1  ;;  %v693_v5 = vunpack.c.l.bf16 %v604_v2  ;;  %v695_v6 = vunpack.c.h.bf16 %v616_v0  ;;  %v586_v21 = vld [vmem:[%s862_s1 + $0x8] sm:$0xff]  ;;  %v588_v22 = vld [vmem:[%s862_s1 + $0x18] sm:$0xff]  ;;  %v585_v25 = vld [vmem:[%s862_s1] sm:$0xff] }
   0x3   :  { %v703_v10 = vunpack.c.h.bf16 %v615_v1  ;;  %v705_v11 = vunpack.c.h.bf16 %v604_v2  ;;  %179 = vmatpush.bf16.msra.mxu0 %v586_v21  ;;  %219 = vmatpush.bf16.msra.mxu1 %v588_v22  ;;  %v590_v23 = vld [vmem:[%s862_s1 + $0x28] sm:$0xff]  ;;  %v592_v24 = vld [vmem:[%s862_s1 + $0x38] sm:$0xff]  ;;  %v587_v26 = vld [vmem:[%s862_s1 + $0x10] sm:$0xff] }
   0x4   :  { %v108_v7 = vmul.f32 %v689_v3, %v689_v3  ;;  %v76_v8 = vmul.f32 %v691_v4, %v691_v4  ;;  %v43_v9 = vmul.f32 %v693_v5, %v693_v5  ;;  %v109_v15 = vmul.f32 %v695_v6, %v695_v6  ;;  %256 = vmatpush.bf16.msra.mxu2 %v590_v23  ;;  %v589_v27 = vld [vmem:[%s862_s1 + $0x20] sm:$0xff]  ;;  %v591_v28 = vld [vmem:[%s862_s1 + $0x30] sm:$0xff]  ;;  %v594_v35 = vld [vmem:[%s862_s1 + $0x48] sm:$0xff] }
   0x5   :  { %v77_v16 = vmul.f32 %v703_v10, %v703_v10  ;;  %v44_v17 = vmul.f32 %v705_v11, %v705_v11  ;;  %293 = vmatpush.bf16.msra.mxu3 %v592_v24  ;;  %v596_v36 = vld [vmem:[%s862_s1 + $0x58] sm:$0xff]  ;;  %v593_v37 = vld [vmem:[%s862_s1 + $0x40] sm:$0xff]  ;;  %v595_v38 = vld [vmem:[%s862_s1 + $0x50] sm:$0xff] }
   0x6   :  { %v110_v12 = vsel %vm45_vm0, %v108_v7, 0.0  ;;  %v78_v13 = vsel %vm45_vm0, %v76_v8, 0.0  ;;  %v46_v14 = vsel %vm45_vm0, %v43_v9, 0.0  ;;  %v113_v18 = vsel %vm45_vm0, %v109_v15, 0.0 }
   0x7   :  { %111 = vadd.xlane.f32.xlu1 %v110_v12  ;;  %79 = vadd.xlane.f32.xlu0 %v78_v13  ;;  %v81_v19 = vsel %vm45_vm0, %v77_v16, 0.0  ;;  %v49_v20 = vsel %vm45_vm0, %v44_v17, 0.0 }
   0x8   :  { %47 = vadd.xlane.f32.xlu2 %v46_v14  ;;  %180 = vmatpush.bf16.msra.mxu0 %v585_v25 }
   0x9   :  { %220 = vmatpush.bf16.msra.mxu1 %v587_v26  ;;  %257 = vmatpush.bf16.msra.mxu2 %v589_v27 }
   0xa   :  { %294 = vmatpush.bf16.msra.mxu3 %v591_v28 }
   0xc   :  { %330 = vmatpush.bf16.msrb.mxu0 %v594_v35 }
   0xd   :  { %367 = vmatpush.bf16.msrb.mxu1 %v596_v36 }
   0xf   :  { %114 = vadd.xlane.f32.xlu1 %v113_v18  ;;  %82 = vadd.xlane.f32.xlu0 %v81_v19 }
  0x10   :  { %50 = vadd.xlane.f32.xlu2 %v49_v20  ;;  %331 = vmatpush.bf16.msrb.mxu0 %v593_v37 }
  0x11   :  { %368 = vmatpush.bf16.msrb.mxu1 %v595_v38 }
  0x7a   :  { %v112_v29 = vpop.xlane.xlu1 %111  ;;  %v80_v30 = vpop.xlane.xlu0 %79 }
  0x7b   :  { %v116_v31 = vmax.f32 %v112_v29, 1e-24  ;;  %v743_v32 = vmax.f32 %v80_v30, 1e-24  ;;  %v48_v33 = vpop.xlane.xlu2 %47 }
  0x7c   :  { %v745_v34 = vmax.f32 %v48_v33, 1e-24 }
  0x7d   :  { %620 = vrsqrt.f32 %v116_v31  ;;  %vm124_vm1 = vweird.f32 %v116_v31  ;;  %vm92_vm6 = vweird.f32 %v743_v32 }
  0x7e   :  { %622 = vrsqrt.f32 %v743_v32  ;;  %vm60_vm7 = vweird.f32 %v745_v34 }
  0x7f   :  { %624 = vrsqrt.f32 %v745_v34 }
  0x82   :  { %v115_v39 = vpop.xlane.xlu1 %114  ;;  %v83_v40 = vpop.xlane.xlu0 %82 }
  0x83   :  { %v761_v41 = vpop.eup %620  ;;  %v117_v42 = vmax.f32 %v115_v39, 1e-24  ;;  %v763_v43 = vmax.f32 %v83_v40, 1e-24  ;;  %v51_v44 = vpop.xlane.xlu2 %50 }
  0x84   :  { %v765_v45 = vpop.eup %622  ;;  %v119_v46 = vmul.f32 %v761_v41, %v116_v31  ;;  %v768_v47 = vmax.f32 %v51_v44, 1e-24  ;;  %vm125_vm2 = vweird.f32 %v761_v41 }
  0x85   :  { %v770_v48 = vpop.eup %624  ;;  %v87_v49 = vmul.f32 %v765_v45, %v743_v32  ;;  %626 = vrsqrt.f32 %v117_v42  ;;  %vm93_vm3 = vweird.f32 %v765_v45  ;;  %vm789_vm5 = vmor %vm124_vm1, %vm125_vm2  ;;  %vm134_vm9 = vweird.f32 %v117_v42 }
  0x86   :  { %v120_v50 = vmul.f32 %v761_v41, %v119_v46  ;;  %v55_v51 = vmul.f32 %v770_v48, %v745_v34  ;;  %628 = vrsqrt.f32 %v763_v43  ;;  %vm61_vm4 = vweird.f32 %v770_v48  ;;  %vm795_vm8 = vmor %vm92_vm6, %vm93_vm3 }
  0x87   :  { %v88_v52 = vmul.f32 %v765_v45, %v87_v49  ;;  %630 = vrsqrt.f32 %v768_v47  ;;  %vm805_vm11 = vmor %vm60_vm7, %vm61_vm4  ;;  %vm102_vm15 = vweird.f32 %v763_v43  ;;  %vm70_vm1 = vweird.f32 %v768_v47 }
  0x88   :  { %v121_v53 = vmul.f32 0.5, %v120_v50  ;;  %v56_v54 = vmul.f32 %v770_v48, %v55_v51  ;;  %v600_v50 = vld [vmem:[%s864_s3 + $0x18] sm:$0xff]  ;;  %v599_v51 = vld [vmem:[%s864_s3 + $0x10] sm:$0xff]  ;;  %vm416_vm4 = vcmask 523264  }
  0x89   :  { %v89_v55 = vmul.f32 0.5, %v88_v52  ;;  %424 = vmatpush.bf16.msrb.mxu2 %v600_v50  ;;  %v598_v52 = vld [vmem:[%s864_s3 + $0x8] sm:$0xff] }
  0x8a   :  { %v57_v56 = vmul.f32 0.5, %v56_v54  ;;  %v122_v58 = vsub.f32 1.5, %v121_v53 }
  0x8b   :  { %v627_v57 = vpop.eup %626  ;;  %v90_v59 = vsub.f32 1.5, %v89_v55  ;;  %v597_v55 = vld [vmem:[%s864_s3] sm:$0xff] }
  0x8c   :  { %v629_v60 = vpop.eup %628  ;;  %v58_v61 = vsub.f32 1.5, %v57_v56  ;;  %v129_v62 = vmul.f32 %v627_v57, %v117_v42  ;;  %v123_v7 = vmul.f32 %v761_v41, %v122_v58  ;;  %vm135_vm10 = vweird.f32 %v627_v57  ;;  %v617_v56 = vld [vmem:[%s861_s2] ss:$0 sm:$0xff] }
  0x8d   :  { %v631_v63 = vpop.eup %630  ;;  %v97_v0 = vmul.f32 %v629_v60, %v763_v43  ;;  %v91_v8 = vmul.f32 %v765_v45, %v90_v59  ;;  %vm103_vm12 = vweird.f32 %v629_v60  ;;  %vm136_vm14 = vmor %vm134_vm9, %vm135_vm10  ;;  %425 = vmatpush.bf16.msrb.mxu2 %v599_v51 }
  0x8e   :  { %v130_v1 = vmul.f32 %v627_v57, %v129_v62  ;;  %v65_v2 = vmul.f32 %v631_v63, %v768_v47  ;;  %v59_v12 = vmul.f32 %v770_v48, %v58_v61  ;;  %v127_v20 = vsel %vm789_vm5, %v761_v41, %v123_v7  ;;  %vm104_vm2 = vmor %vm102_vm15, %vm103_vm12 }
  0x8f   :  { %v98_v9 = vmul.f32 %v629_v60, %v97_v0  ;;  %v95_v21 = vsel %vm795_vm8, %v765_v45, %v91_v8  ;;  %vm71_vm13 = vweird.f32 %v631_v63  ;;  %v138_v28 = vmul.f32 %v689_v3, %v127_v20 }
  0x90   :  { %v131_v13 = vmul.f32 0.5, %v130_v1  ;;  %v66_v14 = vmul.f32 %v631_v63, %v65_v2  ;;  %v63_v24 = vsel %vm805_vm11, %v770_v48, %v59_v12  ;;  %v106_v31 = vmul.f32 %v691_v4, %v95_v21  ;;  %vm72_vm3 = vmor %vm70_vm1, %vm71_vm13 }
  0x91   :  { %v99_v16 = vmul.f32 0.5, %v98_v9  ;;  %v74_v34 = vmul.f32 %v693_v5, %v63_v24  ;;  %426 = vmatpush.bf16.msrb.mxu2 %v598_v52  ;;  %v602_v24 = vld [vmem:[%s865_s5 + $0x8] sm:$0xff]  ;;  %vm474_vm5 = vcmask 7168  }
  0x92   :  { %v132_v18 = vsub.f32 1.5, %v131_v13  ;;  %v67_v19 = vmul.f32 0.5, %v66_v14  ;;  %v142_v40 = vmul.f32 %v138_v28, %v106_v31  ;;  %v148_v43 = vsub.f32 %v138_v28, %v106_v31  ;;  %466 = vmatpush.bf16.msrb.mxu3 %v602_v24 }
  0x93   :  { %v100_v23 = vsub.f32 1.5, %v99_v16  ;;  %v140_v41 = vmul.f32 %v138_v28, %v74_v34  ;;  %v144_v44 = vsub.f32 %v138_v28, %v74_v34 }
  0x94   :  { %v133_v25 = vmul.f32 %v627_v57, %v132_v18  ;;  %v68_v26 = vsub.f32 1.5, %v67_v19  ;;  %v150_v46 = vand.u32 2147483647, %v148_v43 }
  0x95   :  { %v101_v27 = vmul.f32 %v629_v60, %v100_v23  ;;  %v146_v47 = vand.u32 2147483647, %v144_v44  ;;  %427 = vmatpush.bf16.msrb.mxu2 %v597_v55 }
  0x96   :  { %v137_v29 = vsel %vm136_vm14, %v627_v57, %v133_v25  ;;  %v69_v30 = vmul.f32 %v631_v63, %v68_v26  ;;  %v601_v25 = vld [vmem:[%s865_s5] sm:$0xff]  ;;  %v12_v26 = vstv %s866_s6 }
  0x97   :  { %v139_v32 = vmul.f32 %v695_v6, %v137_v29  ;;  %v105_v33 = vsel %vm104_vm2, %v629_v60, %v101_v27  ;;  %467 = vmatpush.bf16.msrb.mxu3 %v601_v25  ;;  %13 = vst [vmem:[#allocation2] sm:$0x1] %v12_v26 }
  0x98   :  { %v73_v35 = vsel %vm72_vm3, %v631_v63, %v69_v30  ;;  %v107_v36 = vmul.f32 %v703_v10, %v105_v33 }
  0x99   :  { %v192_v37 = vpack.c.bf16 %v139_v32, %v138_v28  ;;  %v75_v38 = vmul.f32 %v705_v11, %v73_v35  ;;  %v618_v28 = vld [vmem:[%s863_s4] ss:$0 sm:$0xff] }
  0x9a   :  { %v153_v39 = vpack.c.bf16 %v107_v36, %v106_v31  ;;  %v143_v3 = vmul.f32 %v139_v32, %v107_v36  ;;  %v149_v5 = vsub.f32 %v139_v32, %v107_v36 }
  0x9b   :  { %506 = vmatmul.msk.bf16.vlgmr.msra.gmra.mxu1 %vm45_vm0, %v192_v37  ;;  %v141_v42 = vmul.f32 %v139_v32, %v75_v38  ;;  %v145_v10 = vsub.f32 %v139_v32, %v75_v38 }
  0x9c   :  { %493 = vmatmul.msk.bf16.vlgmr.msra.gmra.mxu0 %vm45_vm0, %v153_v39  ;;  %v266_v4 = vpack.c.bf16 %v143_v3, %v142_v40  ;;  %v151_v11 = vand.u32 2147483647, %v149_v5 }
  0x9d   :  { %v229_v6 = vpack.c.bf16 %v141_v42, %v140_v41  ;;  %v147_v45 = vand.u32 2147483647, %v145_v10 }
  0x9e   :  { %532 = vmatmul.msk.bf16.vlgmr.msra.gmra.mxu3 %vm45_vm0, %v266_v4  ;;  %v340_v48 = vpack.c.bf16 %v151_v11, %v150_v46  ;;  %v619_v35 = vld [vmem:[#allocation2] ss:$0 sm:$0xff] }
  0x9f   :  { %519 = vmatmul.msk.bf16.vlgmr.msra.gmra.mxu2 %vm45_vm0, %v229_v6  ;;  %v303_v49 = vpack.c.bf16 %v147_v45, %v146_v47 }
  0xab   :  { %558 = vmatmul.msk.bf16.vlgmr.msrb.gmra.mxu1 %vm45_vm0, %v340_v48 }
  0xac   :  { %545 = vmatmul.msk.bf16.vlgmr.msrb.gmra.mxu0 %vm45_vm0, %v303_v49 }
 0x118   :  { %v222_v53 = vpop.f32.mrf.mxu1 }
 0x119   :  { %v182_v54 = vpop.f32.mrf.mxu0 }
 0x11a   :  { %v190_v58 = vadd.f32 %v617_v56, %v182_v54 }
 0x11c   :  { %v227_v61 = vadd.f32 %v222_v53, %v190_v58 }
 0x120   :  { %v224_v57 = vpop.f32.mrf.mxu1 }
 0x121   :  { %v184_v59 = vpop.f32.mrf.mxu0  ;;  %v296_v62 = vpop.f32.mrf.mxu3 }
 0x122   :  { %v259_v60 = vpop.f32.mrf.mxu2  ;;  %v191_v63 = vadd.f32 %v617_v56, %v184_v59 }
 0x123   :  { %v264_v0 = vadd.f32 %v259_v60, %v227_v61 }
 0x124   :  { %v228_v7 = vadd.f32 %v224_v57, %v191_v63 }
 0x125   :  { %v301_v9 = vadd.f32 %v296_v62, %v264_v0 }
 0x128   :  { %v370_v2 = vpop.f32.mrf.mxu1 }
 0x129   :  { %v333_v1 = vpop.f32.mrf.mxu0  ;;  %v298_v14 = vpop.f32.mrf.mxu3 }
 0x12a   :  { %v261_v8 = vpop.f32.mrf.mxu2  ;;  %v338_v13 = vadd.f32 %v333_v1, %v301_v9 }
 0x12b   :  { %v265_v12 = vadd.f32 %v261_v8, %v228_v7 }
 0x12c   :  { %v375_v16 = vadd.f32 %v370_v2, %v338_v13 }
 0x12d   :  { %v302_v15 = vadd.f32 %v298_v14, %v265_v12 }
 0x12e   :  { %632 = vtanh.f32 %v375_v16 }
 0x130   :  { %v372_v19 = vpop.f32.mrf.mxu1 }
 0x131   :  { %v335_v17 = vpop.f32.mrf.mxu0 }
 0x132   :  { %v339_v18 = vadd.f32 %v335_v17, %v302_v15 }
 0x134   :  { %v376_v20 = vadd.f32 %v372_v19, %v339_v18  ;;  %v633_v21 = vpop.eup %632 }
 0x136   :  { %634 = vtanh.f32 %v376_v20 }
 0x13c   :  { %v635_v22 = vpop.eup %634 }
 0x13d   :  { %v379_v23 = vpack.c.bf16 %v635_v22, %v633_v21 }
 0x13f   :  { %575 = vmatmul.msk.bf16.vlgmr.msrb.gmra.mxu2 %vm416_vm4, %v379_v23 }
 0x1c2   :  { %v429_v27 = vpop.f32.mrf.mxu2 }
 0x1c3   :  { %v430_v29 = vadd.f32 %v618_v28, %v429_v27 }
 0x1c5   :  { %636 = vtanh.f32 %v430_v29 }
 0x1ca   :  { %v431_v30 = vpop.f32.mrf.mxu2 }
 0x1cb   :  { %v432_v31 = vadd.f32 %v618_v28, %v431_v30  ;;  %v637_v32 = vpop.eup %636 }
 0x1cd   :  { %638 = vtanh.f32 %v432_v31 }
 0x1d3   :  { %v639_v33 = vpop.eup %638 }
 0x1d4   :  { %v436_v34 = vpack.c.bf16 %v639_v33, %v637_v32 }
 0x1d6   :  { %584 = vmatmul.msk.bf16.vlgmr.msrb.gmra.mxu3 %vm45_vm0, %v436_v34 }
 0x259   :  { %v469_v36 = vpop.f32.mrf.mxu3 }
 0x25a   :  { %v470_v37 = vadd.f32 %v619_v35, %v469_v36 }
 0x25c   :  { %475 = vst.msk [vmem:[%s867_s7] sm:$0xff] %vm474_vm5, %v470_v37 }
 0x261   :  { %v471_v38 = vpop.f32.mrf.mxu3 }
 0x262   :  { %v472_v39 = vadd.f32 %v619_v35, %v471_v38 }
 0x264   :  { %476 = vst.msk [vmem:[%s867_s7 + $0x8] sm:$0xff] %vm474_vm5, %v472_v39 }

</bundles_post_ra>
